<compile_context>
chip_gen: v7x
topology: tpu7x:2x2x1
jax: 0.10.0
libtpu: 0.0.40
codegen_flags: <defaults>
</compile_context>

<pallas_src>
import jax
import jax.numpy as jnp
from jax.experimental import pallas as pl
from jax.experimental.pallas import tpu as pltpu

LANE = 128
SUBLANE = 8


def _round_up(x, m):
    return (x + m - 1) // m * m


def actor_mlp_kernel(x_ref, w1_ref, b1_ref, w2_ref, b2_ref, w3_ref, b3_ref, out_ref):
    """Fused 3-layer MLP: Linear->ReLU, Linear->ReLU, Linear->Tanh."""
    x = x_ref[...]  # f32 (batch_block, state_dim)

    h1 = jnp.dot(x.astype(jnp.bfloat16), w1_ref[...],
                 preferred_element_type=jnp.float32) + b1_ref[...]
    h1 = jnp.maximum(h1, 0.0)

    h2 = jnp.dot(h1.astype(jnp.bfloat16), w2_ref[...],
                 preferred_element_type=jnp.float32) + b2_ref[...]
    h2 = jnp.maximum(h2, 0.0)

    h3 = jnp.dot(h2.astype(jnp.bfloat16), w3_ref[...],
                 preferred_element_type=jnp.float32) + b3_ref[...]
    out_ref[...] = jnp.tanh(h3).astype(out_ref.dtype)


def prepare_actor_params(params):
    """One-time device-side prep.

    * Weights cast to bf16 (halves weight DMA; MXU-native).
    * Hidden widths and the output width are zero-padded to multiples of 128
      (lane-dense activations / unmasked stores); the matching input rows of
      the next layer's weight are zero-padded too, so results are unchanged.
    * First layer's K (state_dim) stays unpadded.
    f32 master params stay untouched.
    """
    action_dim = int(params["w3"].shape[1])
    state_dim, h1 = params["w1"].shape
    _, h2 = params["w2"].shape

    h1p = _round_up(int(h1), LANE)
    h2p = _round_up(int(h2), LANE)
    outp = _round_up(action_dim, LANE)

    def pad(w, b, rows, cols):
        w = w.astype(jnp.float32)
        b = b.astype(jnp.float32).reshape(1, -1)
        wp = jnp.zeros((rows, cols), jnp.float32).at[:w.shape[0], :w.shape[1]].set(w)
        bp = jnp.zeros((1, cols), jnp.float32).at[:, :b.shape[1]].set(b)
        return wp.astype(jnp.bfloat16), bp

    w1, b1 = pad(params["w1"], params["b1"], int(state_dim), h1p)
    w2, b2 = pad(params["w2"], params["b2"], h1p, h2p)
    w3, b3 = pad(params["w3"], params["b3"], h2p, outp)

    return {"w1": w1, "b1": b1, "w2": w2, "b2": b2, "w3": w3, "b3": b3,
            "action_dim": action_dim}


def actor_forward(state, prepared, *, block_batch=1024, out_dtype=jnp.float32):
    """Pallas-backed Actor.forward.

    Args:
        state: (batch, state_dim) or (state_dim,) array.
        prepared: output of prepare_actor_params(params).
        block_batch: max rows per grid step (weights stay VMEM-resident across
            grid steps of one call).
        out_dtype: dtype of the returned actions (float32 matches the PyTorch
            module; bfloat16 halves the padded-output HBM writeback).
    Returns:
        (batch, action_dim) actions in [-1, 1].
    """
    if state.ndim == 1:
        state = state[None, :]
    state = state.astype(jnp.float32)

    w1, b1 = prepared["w1"], prepared["b1"]
    w2, b2 = prepared["w2"], prepared["b2"]
    w3, b3 = prepared["w3"], prepared["b3"]
    action_dim = prepared["action_dim"]

    batch, state_dim = state.shape
    h1d, h2d = w1.shape[1], w2.shape[1]
    out_pad = w3.shape[1]

    # --- batch block / padding policy -------------------------------------
    # Pad the batch only to the 8-row sublane granule; never to a multiple of
    # the batch block. A ragged last block is handled by pl.cdiv + Pallas
    # (OOB rows are not written back), so no MXU work is wasted on padding.
    padded = _round_up(batch, SUBLANE)
    block_batch = _round_up(max(int(block_batch), SUBLANE), SUBLANE)
    if padded <= block_batch:
        if padded >= 1024:
            # Big-but-single-block case: split in two so both TensorCores on
            # v7x engage (extra ~310 KB weight DMA per core is negligible).
            bb = _round_up(pl.cdiv(padded, 2), SUBLANE)
        else:
            bb = padded
    else:
        bb = block_batch
    grid = (pl.cdiv(padded, bb),)

    if padded != batch:
        state = jnp.pad(state, ((0, padded - batch), (0, 0)))

    flops = 2 * padded * (state_dim * h1d + h1d * h2d + h2d * out_pad)
    bytes_accessed = (
        padded * state_dim * 4                                   # f32 input
        + padded * out_pad * jnp.dtype(out_dtype).itemsize       # output slab
        + (w1.size + w2.size + w3.size) * 2                      # bf16 weights
        + (b1.size + b2.size + b3.size) * 4                      # f32 biases
    )
    cost = pl.CostEstimate(flops=int(flops),
                           transcendentals=int(padded * out_pad),
                           bytes_accessed=int(bytes_accessed))

    out = pl.pallas_call(
        actor_mlp_kernel,
        out_shape=jax.ShapeDtypeStruct((padded, out_pad), out_dtype),
        grid=grid,
        in_specs=[
            pl.BlockSpec((bb, state_dim), lambda i: (i, 0)),       # state: per-block
            pl.BlockSpec((state_dim, h1d), lambda i: (0, 0)),      # weights: resident
            pl.BlockSpec((1, h1d), lambda i: (0, 0)),
            pl.BlockSpec((h1d, h2d), lambda i: (0, 0)),
            pl.BlockSpec((1, h2d), lambda i: (0, 0)),
            pl.BlockSpec((h2d, out_pad), lambda i: (0, 0)),
            pl.BlockSpec((1, out_pad), lambda i: (0, 0)),
        ],
        out_specs=pl.BlockSpec((bb, out_pad), lambda i: (i, 0)),
        compiler_params=pltpu.CompilerParams(
            dimension_semantics=("parallel",)),
        cost_estimate=cost,
    )(state, w1, b1, w2, b2, w3, b3)

    # TODO(synk): for per-timestep RL action selection (batch<=8), keep the
    # ~310 KB of weights VMEM-resident across pallas_calls via a cross-call
    # prefetch (P10: setup call starts the weight DMA and returns
    # SEMAPHORE+VMEM refs with has_side_effects=True); per-call weight DMA
    # dominates that path, especially on v5e.
    return out[:batch, :action_dim]


# ----------------------------- init & reference -----------------------------

def xavier_uniform(key, fan_in, fan_out, dtype=jnp.float32):
    # Matches torch.nn.init.xavier_uniform_ (gain=1.0) bound.
    bound = jnp.sqrt(6.0 / (fan_in + fan_out))
    return jax.random.uniform(key, (fan_in, fan_out), dtype=dtype,
                              minval=-bound, maxval=bound)


def init_actor_params(key, state_dim, action_dim, hidden_dims=(256, 400)):
    dims = [state_dim, *hidden_dims, action_dim]
    keys = jax.random.split(key, len(dims) - 1)
    params = {}
    for i, (d_in, d_out) in enumerate(zip(dims[:-1], dims[1:]), start=1):
        params[f"w{i}"] = xavier_uniform(keys[i - 1], d_in, d_out)
        params[f"b{i}"] = jnp.zeros((1, d_out), jnp.float32)  # nn.init.constant_(bias, 0)
    return params


def ref_forward_bf16(x, params):
    """Plain-JAX reference with the same bf16-at-the-MXU-boundary casts.

    Note: bf16 weights/activation casts deviate ~1e-2 from a pure-f32 PyTorch
    forward; acceptable for DDPG action selection.
    """
    x = x.astype(jnp.float32)
    h = jnp.dot(x.astype(jnp.bfloat16), params["w1"].astype(jnp.bfloat16),
                preferred_element_type=jnp.float32) + params["b1"]
    h = jnp.maximum(h, 0.0)
    h = jnp.dot(h.astype(jnp.bfloat16), params["w2"].astype(jnp.bfloat16),
                preferred_element_type=jnp.float32) + params["b2"]
    h = jnp.maximum(h, 0.0)
    h = jnp.dot(h.astype(jnp.bfloat16), params["w3"].astype(jnp.bfloat16),
                preferred_element_type=jnp.float32) + params["b3"]
    return jnp.tanh(h)


if __name__ == "__main__":
    # MuJoCo-like shapes: state_dim=17, action_dim=6, hidden_dims=[256, 400]
    # (defaults of the PyTorch module).
    key = jax.random.PRNGKey(0)
    pkey, skey1, skey2 = jax.random.split(key, 3)

    state_dim, action_dim = 17, 6
    params = init_actor_params(pkey, state_dim, action_dim, hidden_dims=(256, 400))
    prepared = prepare_actor_params(params)

    # Case 1: tiny batch (batch=2), like single-env action selection.
    state_small = jax.random.normal(skey1, (2, state_dim), dtype=jnp.float32)
    act_small = jax.block_until_ready(actor_forward(state_small, prepared))

    # Case 2: non-aligned batch (batch=300) -> pads only to 304 rows, grid=(1,).
    state_big = jax.random.normal(skey2, (300, state_dim), dtype=jnp.float32)
    act_big = jax.block_until_ready(actor_forward(state_big, prepared))

    # Case 3: same batch with a small block (multi-step grid, ragged last
    # block, weights resident in VMEM across blocks).
    act_big_blk = jax.block_until_ready(
        actor_forward(state_big, prepared, block_batch=128))

    ref_small = ref_forward_bf16(state_small, params)
    ref_big = ref_forward_bf16(state_big, params)

    assert act_small.shape == (2, action_dim)
    assert act_big.shape == (300, action_dim)
    assert act_big_blk.shape == (300, action_dim)
    assert bool(jnp.all(jnp.abs(act_small) <= 1.0))
    assert bool(jnp.all(jnp.abs(act_big) <= 1.0))
    # bf16-weight path: compare against a reference using the same casts.
    assert bool(jnp.allclose(act_small, ref_small, atol=1e-2, rtol=1e-2))
    assert bool(jnp.allclose(act_big, ref_big, atol=1e-2, rtol=1e-2))
    assert bool(jnp.allclose(act_big_blk, ref_big, atol=1e-2, rtol=1e-2))

    print("KERNEL_OK")
</pallas_src>

<mosaic_0001>
module attributes {stable_mosaic.version = 11 : i64} {
  func.func @actor_mlp_kernel(%arg0: i32, %arg1: memref<8x17xf32, #tpu.memory_space<vmem>>, %arg2: memref<17x256xbf16, #tpu.memory_space<vmem>>, %arg3: memref<1x256xf32, #tpu.memory_space<vmem>>, %arg4: memref<256x512xbf16, #tpu.memory_space<vmem>>, %arg5: memref<1x512xf32, #tpu.memory_space<vmem>>, %arg6: memref<512x128xbf16, #tpu.memory_space<vmem>>, %arg7: memref<1x128xf32, #tpu.memory_space<vmem>>, %arg8: memref<8x128xf32, #tpu.memory_space<vmem>>) attributes {dimension_semantics = [#tpu.dimension_semantics<parallel>], iteration_bounds = array<i64: 1>, scalar_prefetch = 0 : i64, scratch_operands = 0 : i64, tpu.core_type = #tpu.core_type<tc>, window_params = [{transform_indices = @transform_0, window_bounds = array<i64: 8, 17>}, {pipeline_mode = #tpu.pipeline_mode<synchronous>, transform_indices = @transform_1, window_bounds = array<i64: 17, 256>}, {pipeline_mode = #tpu.pipeline_mode<synchronous>, transform_indices = @transform_2, window_bounds = array<i64: 1, 256>}, {pipeline_mode = #tpu.pipeline_mode<synchronous>, transform_indices = @transform_3, window_bounds = array<i64: 256, 512>}, {pipeline_mode = #tpu.pipeline_mode<synchronous>, transform_indices = @transform_4, window_bounds = array<i64: 1, 512>}, {pipeline_mode = #tpu.pipeline_mode<synchronous>, transform_indices = @transform_5, window_bounds = array<i64: 512, 128>}, {pipeline_mode = #tpu.pipeline_mode<synchronous>, transform_indices = @transform_6, window_bounds = array<i64: 1, 128>}, {transform_indices = @transform_7, window_bounds = array<i64: 8, 128>}]} {
    %c0 = arith.constant 0 : index
    %c0_0 = arith.constant 0 : index
    %0 = vector.load %arg1[%c0, %c0_0] : memref<8x17xf32, #tpu.memory_space<vmem>>, vector<8x17xf32>
    %1 = arith.truncf %0 : vector<8x17xf32> to vector<8x17xbf16>
    %c0_1 = arith.constant 0 : index
    %c0_2 = arith.constant 0 : index
    %2 = vector.load %arg2[%c0_1, %c0_2] : memref<17x256xbf16, #tpu.memory_space<vmem>>, vector<17x256xbf16>
    %cst = arith.constant dense<0.000000e+00> : vector<8x256xf32>
    %3 = tpu.matmul %1, %2, %cst {dimension_numbers = #tpu.dot_dimension_numbers<[1], [0], [0], [1], [0, 0, 1, 1], [], []>} : vector<8x17xbf16>, vector<17x256xbf16>, vector<8x256xf32> -> vector<8x256xf32>
    %c0_3 = arith.constant 0 : index
    %c0_4 = arith.constant 0 : index
    %4 = vector.load %arg3[%c0_3, %c0_4] : memref<1x256xf32, #tpu.memory_space<vmem>>, vector<1x256xf32>
    %5 = vector.broadcast %4 : vector<1x256xf32> to vector<8x256xf32>
    %6 = arith.addf %3, %5 : vector<8x256xf32>
    %cst_5 = arith.constant 0.000000e+00 : f32
    %7 = vector.broadcast %cst_5 : f32 to vector<8x256xf32>
    %8 = arith.maximumf %6, %7 : vector<8x256xf32>
    %9 = arith.truncf %8 : vector<8x256xf32> to vector<8x256xbf16>
    %c0_6 = arith.constant 0 : index
    %c0_7 = arith.constant 0 : index
    %10 = vector.load %arg4[%c0_6, %c0_7] : memref<256x512xbf16, #tpu.memory_space<vmem>>, vector<256x512xbf16>
    %cst_8 = arith.constant dense<0.000000e+00> : vector<8x512xf32>
    %11 = tpu.matmul %9, %10, %cst_8 {dimension_numbers = #tpu.dot_dimension_numbers<[1], [0], [0], [1], [0, 0, 1, 1], [], []>} : vector<8x256xbf16>, vector<256x512xbf16>, vector<8x512xf32> -> vector<8x512xf32>
    %c0_9 = arith.constant 0 : index
    %c0_10 = arith.constant 0 : index
    %12 = vector.load %arg5[%c0_9, %c0_10] : memref<1x512xf32, #tpu.memory_space<vmem>>, vector<1x512xf32>
    %13 = vector.broadcast %12 : vector<1x512xf32> to vector<8x512xf32>
    %14 = arith.addf %11, %13 : vector<8x512xf32>
    %cst_11 = arith.constant 0.000000e+00 : f32
    %15 = vector.broadcast %cst_11 : f32 to vector<8x512xf32>
    %16 = arith.maximumf %14, %15 : vector<8x512xf32>
    %17 = arith.truncf %16 : vector<8x512xf32> to vector<8x512xbf16>
    %c0_12 = arith.constant 0 : index
    %c0_13 = arith.constant 0 : index
    %18 = vector.load %arg6[%c0_12, %c0_13] : memref<512x128xbf16, #tpu.memory_space<vmem>>, vector<512x128xbf16>
    %cst_14 = arith.constant dense<0.000000e+00> : vector<8x128xf32>
    %19 = tpu.matmul %17, %18, %cst_14 {dimension_numbers = #tpu.dot_dimension_numbers<[1], [0], [0], [1], [0, 0, 1, 1], [], []>} : vector<8x512xbf16>, vector<512x128xbf16>, vector<8x128xf32> -> vector<8x128xf32>
    %c0_15 = arith.constant 0 : index
    %c0_16 = arith.constant 0 : index
    %20 = vector.load %arg7[%c0_15, %c0_16] : memref<1x128xf32, #tpu.memory_space<vmem>>, vector<1x128xf32>
    %21 = vector.broadcast %20 : vector<1x128xf32> to vector<8x128xf32>
    %22 = arith.addf %19, %21 : vector<8x128xf32>
    %23 = math.tanh %22 : vector<8x128xf32>
    %c0_17 = arith.constant 0 : index
    %c0_18 = arith.constant 0 : index
    %24 = vector.load %arg8[%c0_17, %c0_18] : memref<8x128xf32, #tpu.memory_space<vmem>>, vector<8x128xf32>
    tpu.vector_store %arg8[%c0_17, %c0_18], %23 {strides = array<i32>} : memref<8x128xf32, #tpu.memory_space<vmem>>, vector<8x128xf32>,
    return
  }
  func.func @transform_0(%arg0: i32) -> (i32, i32) {
    %c0_i32 = arith.constant 0 : i32
    %c0_i32_0 = arith.constant 0 : i32
    return %arg0, %c0_i32 : i32, i32
  }
  func.func @transform_1(%arg0: i32) -> (i32, i32) {
    %c0_i32 = arith.constant 0 : i32
    %c0_i32_0 = arith.constant 0 : i32
    %c0_i32_1 = arith.constant 0 : i32
    return %c0_i32, %c0_i32_0 : i32, i32
  }
  func.func @transform_2(%arg0: i32) -> (i32, i32) {
    %c0_i32 = arith.constant 0 : i32
    %c0_i32_0 = arith.constant 0 : i32
    %c0_i32_1 = arith.constant 0 : i32
    return %c0_i32, %c0_i32_0 : i32, i32
  }
  func.func @transform_3(%arg0: i32) -> (i32, i32) {
    %c0_i32 = arith.constant 0 : i32
    %c0_i32_0 = arith.constant 0 : i32
    %c0_i32_1 = arith.constant 0 : i32
    return %c0_i32, %c0_i32_0 : i32, i32
  }
  func.func @transform_4(%arg0: i32) -> (i32, i32) {
    %c0_i32 = arith.constant 0 : i32
    %c0_i32_0 = arith.constant 0 : i32
    %c0_i32_1 = arith.constant 0 : i32
    return %c0_i32, %c0_i32_0 : i32, i32
  }
  func.func @transform_5(%arg0: i32) -> (i32, i32) {
    %c0_i32 = arith.constant 0 : i32
    %c0_i32_0 = arith.constant 0 : i32
    %c0_i32_1 = arith.constant 0 : i32
    return %c0_i32, %c0_i32_0 : i32, i32
  }
  func.func @transform_6(%arg0: i32) -> (i32, i32) {
    %c0_i32 = arith.constant 0 : i32
    %c0_i32_0 = arith.constant 0 : i32
    %c0_i32_1 = arith.constant 0 : i32
    return %c0_i32, %c0_i32_0 : i32, i32
  }
  func.func @transform_7(%arg0: i32) -> (i32, i32) {
    %c0_i32 = arith.constant 0 : i32
    %c0_i32_0 = arith.constant 0 : i32
    return %arg0, %c0_i32 : i32, i32
  }
}

</mosaic_0001>

<bundles_post_ra>
// kernel: tpu_custom_call.1
= control target key start
LH: loop header
LB: loop body
LE: loop exit
PB: predicated region body
PF: predicated region fallthrough
CT: control target
= control target key end

     0   :  { %12 = vsyncpa [#allocation3], 0  ;;  %s1575_s0 = inlined_call_operand.hbm [shape: f32[8,17], index: 0, kind: input, shape index: {}]   ;;  %s1576_s1 = inlined_call_operand.hbm [shape: bf16[17,256], index: 1, kind: input, shape index: {}]   ;;  %s1577_s2 = inlined_call_operand.vmem [shape: f32[1,256], index: 2, kind: input, shape index: {}]   ;;  %s1578_s3 = inlined_call_operand.hbm [shape: bf16[256,512], index: 3, kind: input, shape index: {}]   ;;  %s1579_s4 = inlined_call_operand.vmem [shape: f32[1,512], index: 4, kind: input, shape index: {}]   ;;  %s1580_s5 = inlined_call_operand.hbm [shape: bf16[512,128], index: 5, kind: input, shape index: {}]   ;;  %s1581_s6 = inlined_call_operand.vmem [shape: f32[1,128], index: 6, kind: input, shape index: {}]   ;;  %s1582_s7 = inlined_call_operand.hbm [shape: f32[8,128], index: 7, kind: output, shape index: {}]  }
   0x1   :  { %13 = vsyncpa [#allocation6], 0 }
   0x2   :  { %14 = vsyncpa [#allocation9], 0 }
   0x3   :  { %15 = vsyncpa [#allocation4], 0  ;;  %s1440_s24 = smov [#allocation5]   ;;  %s1322_s28 = scalar_lea.hbm %s1576_s1, 384 }
   0x4   :  { %s31_s25 = sshll.u32 %s1440_s24, 4  ;;  %p1323_p0 = scmp.ne.s32.totalorder %s1576_s1, %s1322_s28  ;;  %s32_s25 = int_to_ptr.vmem [resolvable:$true] %s31_s25 }
   0x5   :  { %p1326_p1 = scmp.lt.u32.totalorder %s1322_s28, %s1576_s1 }
   0x7   :  { %p1328_p2 = pnand %p1326_p1, %p1323_p0 }
   0x9   :  { %1331 = shalt.err (!%p1328_p2)
}
   0xa   :  { %s1332_s10 = scalar_lea.vmem %s32_s25, 384  ;;  %p1337_p4 = scmp.lt.s32.totalorder %s32_s25, %s32_s25 }
   0xb   :  { %p1333_p3 = scmp.ne.s32.totalorder %s32_s25, %s1332_s10  ;;  %p1338_p5 = scmp.lt.s32.totalorder %s1332_s10, %s1332_s10 }
   0xd   :  { %p1339_p6 = por %p1338_p5, %p1337_p4 }
   0xf   :  { %p1340_p7 = pnand %p1339_p6, %p1333_p3 }
  0x11   :  { %1343 = shalt.err (!%p1340_p7)
}
  0x12   :  { %s1441_s11 = smov 128   ;;  %s1442_s12 = smov 8  }
  0x13   :  { %37 = dma.hbm_to_vmem [thread:$0]  %s1576_s1, 384, %s32_s25, [#allocation6], %s1441_s11, %s1441_s11, %s1442_s12  }
  0x14   :  { %s1443_s15 = smov [#allocation2]   ;;  %s1444_s17 = smov [#allocation7]  }
  0x15   :  { %s22_s16 = sshll.u32 %s1443_s15, 4  ;;  %s45_s18 = sshll.u32 %s1444_s17, 4  ;;  %s23_s16 = int_to_ptr.vmem [resolvable:$true] %s22_s16  ;;  %s46_s18 = int_to_ptr.vmem [resolvable:$true] %s45_s18 }
  0x16   :  { %s1344_s21 = scalar_lea.hbm %s1575_s0, 128 }
  0x17   :  { %p1345_p8 = scmp.ne.s32.totalorder %s1575_s0, %s1344_s21  ;;  %p1348_p9 = scmp.lt.u32.totalorder %s1344_s21, %s1575_s0 }
  0x19   :  { %p1350_p10 = pnand %p1348_p9, %p1345_p8 }
  0x1b   :  { %1353 = shalt.err (!%p1350_p10)
}
  0x1c   :  { %s1354_s1 = scalar_lea.vmem %s23_s16, 128  ;;  %p1359_p12 = scmp.lt.s32.totalorder %s23_s16, %s23_s16 }
  0x1d   :  { %p1355_p11 = scmp.ne.s32.totalorder %s23_s16, %s1354_s1  ;;  %p1360_p13 = scmp.lt.s32.totalorder %s1354_s1, %s1354_s1 }
  0x1f   :  { %p1361_p0 = por %p1360_p13, %p1359_p12 }
  0x21   :  { %p1362_p1 = pnand %p1361_p0, %p1355_p11 }
  0x23   :  { %1365 = shalt.err (!%p1362_p1)
}
  0x24   :  { %25 = dma.hbm_to_vmem [thread:$0]  %s1575_s0, 128, %s23_s16, [#allocation3]  }
  0x25   :  { %s1366_s30 = scalar_lea.hbm %s1578_s3, 8192 }
  0x26   :  { %p1367_p2 = scmp.ne.s32.totalorder %s1578_s3, %s1366_s30  ;;  %p1370_p3 = scmp.lt.u32.totalorder %s1366_s30, %s1578_s3 }
  0x28   :  { %p1372_p4 = pnand %p1370_p3, %p1367_p2 }
  0x2a   :  { %1375 = shalt.err (!%p1372_p4)
}
  0x2b   :  { %s1376_s12 = scalar_lea.vmem %s46_s18, 8192  ;;  %p1381_p6 = scmp.lt.s32.totalorder %s46_s18, %s46_s18 }
  0x2c   :  { %p1377_p5 = scmp.ne.s32.totalorder %s46_s18, %s1376_s12  ;;  %p1382_p7 = scmp.lt.s32.totalorder %s1376_s12, %s1376_s12 }
  0x2e   :  { %p1383_p8 = por %p1382_p7, %p1381_p6 }
  0x30   :  { %p1384_p9 = pnand %p1383_p8, %p1377_p5 }
  0x32   :  { %1387 = shalt.err (!%p1384_p9)
}
  0x33   :  { %s1445_s0 = smov 256   ;;  %s1446_s13 = smov 16  }
  0x34   :  { %51 = dma.hbm_to_vmem [thread:$0]  %s1578_s3, 8192, %s46_s18, [#allocation6], %s1445_s0, %s1445_s0, %s1446_s13  }
  0x35   :  { %s1447_s16 = smov [#allocation8]   ;;  %s1388_s21 = scalar_lea.hbm %s1580_s5, 4096 }
  0x36   :  { %s59_s17 = sshll.u32 %s1447_s16, 4  ;;  %p1389_p10 = scmp.ne.s32.totalorder %s1580_s5, %s1388_s21  ;;  %s60_s17 = int_to_ptr.vmem [resolvable:$true] %s59_s17 }
  0x37   :  { %p1392_p11 = scmp.lt.u32.totalorder %s1388_s21, %s1580_s5 }
  0x39   :  { %p1394_p12 = pnand %p1392_p11, %p1389_p10 }
  0x3b   :  { %1397 = shalt.err (!%p1394_p12)
}
  0x3c   :  { %s1398_s1 = scalar_lea.vmem %s60_s17, 4096  ;;  %p1403_p0 = scmp.lt.s32.totalorder %s60_s17, %s60_s17 }
  0x3d   :  { %p1399_p13 = scmp.ne.s32.totalorder %s60_s17, %s1398_s1  ;;  %p1404_p1 = scmp.lt.s32.totalorder %s1398_s1, %s1398_s1 }
  0x3f   :  { %p1405_p2 = por %p1404_p1, %p1403_p0 }
  0x41   :  { %p1406_p3 = pnand %p1405_p2, %p1399_p13 }
  0x43   :  { %1409 = shalt.err (!%p1406_p3)
}
  0x44   :  { %s1448_s3 = smov 64   ;;  %s1449_s18 = smov 4  }
  0x45   :  { %65 = dma.hbm_to_vmem [thread:$0]  %s1580_s5, 4096, %s60_s17, [#allocation9], %s1448_s3, %s1448_s3, %s1449_s18  }
  0x46   :  { %1432 = dma.done.wait [#allocation3], 128  }
  0x47   :  { %1433 = vsyncadd [#allocation3], 4294967168 }
  0x48   :  { %1434 = dma.done.wait [#allocation6], 8576  }
  0x49   :  { %1435 = vsyncadd [#allocation6], 4294958720 }
  0x4a   :  { %1436 = dma.done.wait [#allocation9], 4096  }
  0x4b   :  { %1437 = vsyncadd [#allocation9], 4294963200  ;;  %v1450_v0 = vmov 0   ;;  %vm117_vm0 = vcmask 1040384   ;;  %v1187_v1 = vld [vmem:[#allocation5 + $0x4] ss:$8 sps:$4 sm:$0xff]  }
  0x4c   :  { %158 = vmatprep.mubr.bf16.mxu0 %v1450_v0  ;;  %v1189_v2 = vld [vmem:[#allocation5] ss:$8 sps:$4 sm:$0xff]   ;;  %v85_v3 = vld [vmem:[#allocation5 + $0x10] sm:$0x11]  ;;  %v119_v4 = vsel %vm117_vm0, 65535, %v1450_v0  ;;  %126 = vmatprep.subr.bf16.mxu0 %v1187_v1  ;;  %v81_v8 = vld [vmem:[#allocation2] sm:$0xff] }
  0x4d   :  { %v1032_v5 = vcombine.high %v85_v3, %v85_v3  ;;  %v1031_v6 = vcombine.low %v85_v3, %v85_v3  ;;  %v1192_v7 = vld [vmem:[#allocation7 + $0x4] ss:$16 sps:$4 sm:$0xff]   ;;  %127 = vmatpush1.bf16.msra.mxu0 %v1189_v2  ;;  %v1196_v11 = vld [vmem:[#allocation7 + $0xc] ss:$16 sps:$4 sm:$0xff]   ;;  %v1197_v12 = vld [vmem:[#allocation7] ss:$16 sps:$4 sm:$0xff]   ;;  %v82_v14 = vpack.c.bf16 %v81_v8, %v81_v8 }
  0x4e   :  { %577 = vmatprep.subr.bf16.mxu1 %v1192_v7  ;;  %v1198_v13 = vld [vmem:[#allocation7 + $0x24] ss:$16 sps:$4 sm:$0xff]   ;;  %v1194_v15 = vld [vmem:[#allocation7 + $0x8] ss:$16 sps:$4 sm:$0xff]   ;;  %v1202_v16 = vld [vmem:[#allocation7 + $0x2c] ss:$16 sps:$4 sm:$0xff]  }
  0x4f   :  { %v124_v9 = vand.u32 %v1032_v5, %v119_v4  ;;  %v121_v10 = vand.u32 %v1031_v6, %v119_v4  ;;  %578 = vmatpush1.bf16.msra.mxu1 %v1197_v12  ;;  %vm113_vm1 = vcmask 138240   ;;  %v1203_v17 = vld [vmem:[#allocation7 + $0x20] ss:$16 sps:$4 sm:$0xff]   ;;  %v1204_v18 = vld [vmem:[#allocation7 + $0x44] ss:$16 sps:$4 sm:$0xff]   ;;  %s1451_s8 = smov [#allocation10]  }
  0x50   :  { %579 = vmatprep.subr.bf16.mxu1 %v1198_v13  ;;  %v1200_v19 = vld [vmem:[#allocation7 + $0x28] ss:$16 sps:$4 sm:$0xff]   ;;  %v1209_v20 = vld [vmem:[#allocation7 + $0x40] ss:$16 sps:$4 sm:$0xff]   ;;  %v1210_v21 = vld [vmem:[#allocation7 + $0x64] ss:$16 sps:$4 sm:$0xff]   ;;  %v88_v13 = vlaneseq }
  0x51   :  { %128 = vmatprep.subr.bf16.mxu0 %v124_v9  ;;  %v1208_v22 = vld [vmem:[#allocation7 + $0x4c] ss:$16 sps:$4 sm:$0xff]   ;;  %v1206_v23 = vld [vmem:[#allocation7 + $0x48] ss:$16 sps:$4 sm:$0xff]   ;;  %v1215_v24 = vld [vmem:[#allocation7 + $0x60] ss:$16 sps:$4 sm:$0xff]  }
  0x52   :  { %129 = vmatpush1.bf16.msra.mxu0 %v121_v10  ;;  %v1216_v25 = vld [vmem:[#allocation7 + $0x84] ss:$16 sps:$4 sm:$0xff]   ;;  %v1214_v26 = vld [vmem:[#allocation7 + $0x6c] ss:$16 sps:$4 sm:$0xff]   ;;  %v1212_v27 = vld [vmem:[#allocation7 + $0x68] ss:$16 sps:$4 sm:$0xff]  }
  0x53   :  { %618 = vmatprep.subr.bf16.mxu0 %v1196_v11  ;;  %580 = vmatpush1.bf16.msra.mxu1 %v1203_v17  ;;  %v1221_v28 = vld [vmem:[#allocation7 + $0x80] ss:$16 sps:$4 sm:$0xff]   ;;  %v1222_v29 = vld [vmem:[#allocation7 + $0xa4] ss:$16 sps:$4 sm:$0xff]   ;;  %v1220_v30 = vld [vmem:[#allocation7 + $0x8c] ss:$16 sps:$4 sm:$0xff]  }
  0x54   :  { %581 = vmatprep.subr.bf16.mxu1 %v1204_v18  ;;  %v1218_v31 = vld [vmem:[#allocation7 + $0x88] ss:$16 sps:$4 sm:$0xff]   ;;  %v1227_v32 = vld [vmem:[#allocation7 + $0xa0] ss:$16 sps:$4 sm:$0xff]   ;;  %v1228_v33 = vld [vmem:[#allocation7 + $0xc4] ss:$16 sps:$4 sm:$0xff]  }
  0x55   :  { %1033 = vmatmul.mubr.msk.bf16.vlgmr.msra.gmra.mrb[0].mxu0 %vm113_vm1, %v82_v14  ;;  %v1226_v34 = vld [vmem:[#allocation7 + $0xac] ss:$16 sps:$4 sm:$0xff]   ;;  %v1224_v35 = vld [vmem:[#allocation7 + $0xa8] ss:$16 sps:$4 sm:$0xff]   ;;  %v1233_v36 = vld [vmem:[#allocation7 + $0xc0] ss:$16 sps:$4 sm:$0xff]  }
  0x56   :  { %619 = vmatpush1.bf16.msra.mxu0 %v1194_v15  ;;  %v1234_v37 = vld [vmem:[#allocation7 + $0xe4] ss:$16 sps:$4 sm:$0xff]   ;;  %v1232_v38 = vld [vmem:[#allocation7 + $0xcc] ss:$16 sps:$4 sm:$0xff]   ;;  %v1230_v39 = vld [vmem:[#allocation7 + $0xc8] ss:$16 sps:$4 sm:$0xff]  }
  0x57   :  { %620 = vmatprep.subr.bf16.mxu0 %v1202_v16  ;;  %582 = vmatpush1.bf16.msra.mxu1 %v1209_v20  ;;  %v1239_v40 = vld [vmem:[#allocation7 + $0xe0] ss:$16 sps:$4 sm:$0xff]   ;;  %v1240_v41 = vld [vmem:[#allocation7 + $0x104] ss:$16 sps:$4 sm:$0xff]   ;;  %v1238_v42 = vld [vmem:[#allocation7 + $0xec] ss:$16 sps:$4 sm:$0xff]  }
  0x58   :  { %583 = vmatprep.subr.bf16.mxu1 %v1210_v21  ;;  %v1236_v43 = vld [vmem:[#allocation7 + $0xe8] ss:$16 sps:$4 sm:$0xff]   ;;  %v1245_v44 = vld [vmem:[#allocation7 + $0x100] ss:$16 sps:$4 sm:$0xff]   ;;  %v1246_v45 = vld [vmem:[#allocation7 + $0x124] ss:$16 sps:$4 sm:$0xff]  }
  0x59   :  { %v1244_v46 = vld [vmem:[#allocation7 + $0x10c] ss:$16 sps:$4 sm:$0xff]   ;;  %v1242_v47 = vld [vmem:[#allocation7 + $0x108] ss:$16 sps:$4 sm:$0xff]   ;;  %v1251_v48 = vld [vmem:[#allocation7 + $0x120] ss:$16 sps:$4 sm:$0xff]  }
  0x5a   :  { %621 = vmatpush1.bf16.msra.mxu0 %v1200_v19  ;;  %v1250_v49 = vld [vmem:[#allocation7 + $0x12c] ss:$16 sps:$4 sm:$0xff]   ;;  %v1252_v50 = vld [vmem:[#allocation7 + $0x144] ss:$16 sps:$4 sm:$0xff]   ;;  %v1257_v51 = vld [vmem:[#allocation7 + $0x140] ss:$16 sps:$4 sm:$0xff]  }
  0x5b   :  { %622 = vmatprep.subr.bf16.mxu0 %v1208_v22  ;;  %584 = vmatpush1.bf16.msra.mxu1 %v1215_v24  ;;  %v1248_v52 = vld [vmem:[#allocation7 + $0x128] ss:$16 sps:$4 sm:$0xff]   ;;  %v1258_v53 = vld [vmem:[#allocation7 + $0x164] ss:$16 sps:$4 sm:$0xff]   ;;  %v1256_v54 = vld [vmem:[#allocation7 + $0x14c] ss:$16 sps:$4 sm:$0xff]  }
  0x5c   :  { %585 = vmatprep.subr.bf16.mxu1 %v1216_v25  ;;  %v1263_v55 = vld [vmem:[#allocation7 + $0x160] ss:$16 sps:$4 sm:$0xff]   ;;  %v1254_v56 = vld [vmem:[#allocation7 + $0x148] ss:$16 sps:$4 sm:$0xff]   ;;  %v1264_v57 = vld [vmem:[#allocation7 + $0x184] ss:$16 sps:$4 sm:$0xff]  }
  0x5d   :  { %v1262_v58 = vld [vmem:[#allocation7 + $0x16c] ss:$16 sps:$4 sm:$0xff]   ;;  %v1269_v59 = vld [vmem:[#allocation7 + $0x180] ss:$16 sps:$4 sm:$0xff]   ;;  %v1260_v60 = vld [vmem:[#allocation7 + $0x168] ss:$16 sps:$4 sm:$0xff]  }
  0x5e   :  { %623 = vmatpush1.bf16.msra.mxu0 %v1206_v23  ;;  %v1270_v61 = vld [vmem:[#allocation7 + $0x1a4] ss:$16 sps:$4 sm:$0xff]   ;;  %v1268_v62 = vld [vmem:[#allocation7 + $0x18c] ss:$16 sps:$4 sm:$0xff]   ;;  %v1275_v63 = vld [vmem:[#allocation7 + $0x1a0] ss:$16 sps:$4 sm:$0xff]  }
  0x5f   :  { %624 = vmatprep.subr.bf16.mxu0 %v1214_v26  ;;  %586 = vmatpush1.bf16.msra.mxu1 %v1221_v28  ;;  %v1266_v0 = vld [vmem:[#allocation7 + $0x188] ss:$16 sps:$4 sm:$0xff]   ;;  %v1274_v1 = vld [vmem:[#allocation7 + $0x1ac] ss:$16 sps:$4 sm:$0xff]   ;;  %v1276_v3 = vld [vmem:[#allocation7 + $0x1c4] ss:$16 sps:$4 sm:$0xff]  }
  0x60   :  { %587 = vmatprep.subr.bf16.mxu1 %v1222_v29  ;;  %v1272_v2 = vld [vmem:[#allocation7 + $0x1a8] ss:$16 sps:$4 sm:$0xff]   ;;  %v1280_v4 = vld [vmem:[#allocation7 + $0x1cc] ss:$16 sps:$4 sm:$0xff]   ;;  %v1281_v6 = vld [vmem:[#allocation7 + $0x1c0] ss:$16 sps:$4 sm:$0xff]  }
  0x61   :  { %v1278_v5 = vld [vmem:[#allocation7 + $0x1c8] ss:$16 sps:$4 sm:$0xff]   ;;  %v1282_v7 = vld [vmem:[#allocation7 + $0x1e4] ss:$16 sps:$4 sm:$0xff]   ;;  %v1286_v8 = vld [vmem:[#allocation7 + $0x1ec] ss:$16 sps:$4 sm:$0xff]  }
  0x62   :  { %625 = vmatpush1.bf16.msra.mxu0 %v1212_v27  ;;  %v1284_v9 = vld [vmem:[#allocation7 + $0x1e8] ss:$16 sps:$4 sm:$0xff]   ;;  %v1287_v10 = vld [vmem:[#allocation7 + $0x1e0] ss:$16 sps:$4 sm:$0xff]   ;;  %v1540_v14 = vshrl.u32 %v88_v13, 7  ;;  %s1018_s9 = sshll.u32 %s1451_s8, 4  ;;  %s1019_s9 = int_to_ptr.vmem [resolvable:$true] %s1018_s9 }
  0x63   :  { %626 = vmatprep.subr.bf16.mxu0 %v1220_v30  ;;  %588 = vmatpush1.bf16.msra.mxu1 %v1227_v32  ;;  %v1288_v11 = vld [vmem:[#allocation8 + $0x40] sm:$0xff]   ;;  %v1292_v32 = vld [vmem:[#allocation8 + $0x48] sm:$0xff]   ;;  %s1410_s10 = scalar_lea.vmem %s1019_s9, 128  ;;  %p1415_p5 = scmp.lt.s32.totalorder %s1019_s9, %s1019_s9 }
  0x64   :  { %589 = vmatprep.subr.bf16.mxu1 %v1228_v33  ;;  %v1289_v12 = vld [vmem:[#allocation8 + $0xc0] sm:$0xff]   ;;  %v90_v15 = vsub.s32 0, %v1540_v14  ;;  %v94_v17 = vsub.s32 1, %v1540_v14  ;;  %v1293_v33 = vld [vmem:[#allocation8 + $0xc8] sm:$0xff]   ;;  %p1411_p4 = scmp.ne.s32.totalorder %s1019_s9, %s1410_s10  ;;  %p1416_p6 = scmp.lt.s32.totalorder %s1410_s10, %s1410_s10 }
  0x65   :  { %v86_v16 = vld [vmem:[%s1577_s2] sm:$0x3] }
  0x66   :  { %627 = vmatpush1.bf16.msra.mxu0 %v1218_v31  ;;  %v91_v18 = vrot.slane %v86_v16, %v90_v15  ;;  %v95_v19 = vrot.slane %v86_v16, %v94_v17  ;;  %v1290_v29 = vld [vmem:[#allocation8] sm:$0xff]   ;;  %p1417_p7 = por %p1416_p6, %p1415_p5 }
  0x67   :  { %628 = vmatprep.subr.bf16.mxu0 %v1226_v34  ;;  %590 = vmatpush1.bf16.msra.mxu1 %v1233_v36  ;;  %v1291_v30 = vld [vmem:[#allocation8 + $0x80] sm:$0xff]   ;;  %v1294_v34 = vld [vmem:[#allocation8 + $0x8] sm:$0xff]   ;;  %v1296_v36 = vld [vmem:[#allocation8 + $0x50] sm:$0xff]  }
  0x68   :  { %591 = vmatprep.subr.bf16.mxu1 %v1234_v37  ;;  %v1297_v37 = vld [vmem:[#allocation8 + $0xd0] sm:$0xff]   ;;  %p1418_p8 = pnand %p1417_p7, %p1411_p4 }
  0x6a   :  { %629 = vmatpush1.bf16.msra.mxu0 %v1224_v35  ;;  %v1295_v35 = vld [vmem:[#allocation8 + $0x88] sm:$0xff]  }
  0x6b   :  { %630 = vmatprep.subr.bf16.mxu0 %v1232_v38  ;;  %592 = vmatpush1.bf16.msra.mxu1 %v1239_v40  ;;  %v1298_v38 = vld [vmem:[#allocation8 + $0x10] sm:$0xff]   ;;  %v1300_v40 = vld [vmem:[#allocation8 + $0x58] sm:$0xff]  }
  0x6c   :  { %593 = vmatprep.subr.bf16.mxu1 %v1240_v41  ;;  %v1301_v41 = vld [vmem:[#allocation8 + $0xd8] sm:$0xff]  }
  0x6e   :  { %631 = vmatpush1.bf16.msra.mxu0 %v1230_v39  ;;  %v1299_v39 = vld [vmem:[#allocation8 + $0x90] sm:$0xff]  }
  0x6f   :  { %632 = vmatprep.subr.bf16.mxu0 %v1238_v42  ;;  %594 = vmatpush1.bf16.msra.mxu1 %v1245_v44  ;;  %v1302_v42 = vld [vmem:[#allocation8 + $0x18] sm:$0xff]   ;;  %v1304_v44 = vld [vmem:[#allocation8 + $0x60] sm:$0xff]  }
  0x70   :  { %595 = vmatprep.subr.bf16.mxu1 %v1246_v45  ;;  %v1305_v45 = vld [vmem:[#allocation8 + $0xe0] sm:$0xff]  }
  0x72   :  { %633 = vmatpush1.bf16.msra.mxu0 %v1236_v43  ;;  %v1303_v43 = vld [vmem:[#allocation8 + $0x98] sm:$0xff]  }
  0x73   :  { %634 = vmatprep.subr.bf16.mxu0 %v1244_v46  ;;  %596 = vmatpush1.bf16.msra.mxu1 %v1251_v48  ;;  %v1306_v46 = vld [vmem:[#allocation8 + $0x20] sm:$0xff]   ;;  %v1308_v48 = vld [vmem:[#allocation8 + $0x68] sm:$0xff]  }
  0x74   :  { %597 = vmatprep.subr.bf16.mxu1 %v1252_v50  ;;  %v1310_v50 = vld [vmem:[#allocation8 + $0x28] sm:$0xff]  }
  0x76   :  { %635 = vmatpush1.bf16.msra.mxu0 %v1242_v47  ;;  %v1307_v47 = vld [vmem:[#allocation8 + $0xa0] sm:$0xff]  }
  0x77   :  { %636 = vmatprep.subr.bf16.mxu0 %v1250_v49  ;;  %598 = vmatpush1.bf16.msra.mxu1 %v1257_v51  ;;  %v1309_v49 = vld [vmem:[#allocation8 + $0xe8] sm:$0xff]  }
  0x78   :  { %599 = vmatprep.subr.bf16.mxu1 %v1258_v53  ;;  %v1311_v51 = vld [vmem:[#allocation8 + $0xa8] sm:$0xff]   ;;  %v1313_v53 = vld [vmem:[#allocation8 + $0xf0] sm:$0xff]  }
  0x7a   :  { %637 = vmatpush1.bf16.msra.mxu0 %v1248_v52  ;;  %v1312_v52 = vld [vmem:[#allocation8 + $0x70] sm:$0xff]  }
  0x7b   :  { %638 = vmatprep.subr.bf16.mxu0 %v1256_v54  ;;  %600 = vmatpush1.bf16.msra.mxu1 %v1263_v55  ;;  %v1314_v54 = vld [vmem:[#allocation8 + $0x30] sm:$0xff]  }
  0x7c   :  { %601 = vmatprep.subr.bf16.mxu1 %v1264_v57  ;;  %v1315_v55 = vld [vmem:[#allocation8 + $0xb0] sm:$0xff]   ;;  %v1317_v57 = vld [vmem:[#allocation8 + $0xf8] sm:$0xff]  }
  0x7e   :  { %639 = vmatpush1.bf16.msra.mxu0 %v1254_v56  ;;  %v1316_v56 = vld [vmem:[#allocation8 + $0x78] sm:$0xff]  }
  0x7f   :  { %640 = vmatprep.subr.bf16.mxu0 %v1262_v58  ;;  %602 = vmatpush1.bf16.msra.mxu1 %v1269_v59  ;;  %v1318_v58 = vld [vmem:[#allocation8 + $0x38] sm:$0xff]  }
  0x80   :  { %603 = vmatprep.subr.bf16.mxu1 %v1270_v61  ;;  %v1319_v59 = vld [vmem:[#allocation8 + $0xb8] sm:$0xff]   ;;  %v235_v61 = vld [vmem:[%s1579_s4] sm:$0xf] }
  0x82   :  { %641 = vmatpush1.bf16.msra.mxu0 %v1260_v60  ;;  %v247_v60 = vsub.s32 2, %v1540_v14 }
  0x83   :  { %642 = vmatprep.subr.bf16.mxu0 %v1268_v62  ;;  %604 = vmatpush1.bf16.msra.mxu1 %v1275_v63  ;;  %v251_v62 = vsub.s32 3, %v1540_v14  ;;  %v240_v63 = vrot.slane %v235_v61, %v90_v15 }
  0x84   :  { %605 = vmatprep.subr.bf16.mxu1 %v1276_v3 }
  0x86   :  { %643 = vmatpush1.bf16.msra.mxu0 %v1266_v0  ;;  %v248_v0 = vrot.slane %v235_v61, %v247_v60 }
  0x87   :  { %644 = vmatprep.subr.bf16.mxu0 %v1274_v1  ;;  %606 = vmatpush1.bf16.msra.mxu1 %v1281_v6  ;;  %v244_v1 = vrot.slane %v235_v61, %v94_v17 }
  0x88   :  { %607 = vmatprep.subr.bf16.mxu1 %v1282_v7 }
  0x8a   :  { %645 = vmatpush1.bf16.msra.mxu0 %v1272_v2  ;;  %v252_v2 = vrot.slane %v235_v61, %v251_v62 }
  0x8b   :  { %646 = vmatprep.subr.bf16.mxu0 %v1280_v4  ;;  %608 = vmatpush1.bf16.msra.mxu1 %v1287_v10 }
  0x8c   :  { %1131 = vmatprep.subr.bf16.mxu1 %v1288_v11 }
  0x8e   :  { %647 = vmatpush1.bf16.msra.mxu0 %v1278_v5 }
  0x8f   :  { %648 = vmatprep.subr.bf16.mxu0 %v1286_v8 }
  0x92   :  { %649 = vmatpush1.bf16.msra.mxu0 %v1284_v9 }
  0x93   :  { %1153 = vmatprep.subr.bf16.mxu0 %v1289_v12 }
 0x128   :  { %v160_v20 = vpop.f32.mrb[0].mxu0 }
 0x129   :  { %v161_v21 = vadd.f32 %v160_v20, %v91_v18  ;;  %v162_v22 = vpop.f32.mrb[1].mxu0 }
 0x12a   :  { %v163_v23 = vadd.f32 %v162_v22, %v95_v19  ;;  %v164_v24 = vpop.f32.mrb[2].mxu0 }
 0x12b   :  { %v167_v25 = vmax.f32 %v161_v21, 0.0  ;;  %v165_v26 = vpop.f32.mrb[3].mxu0 }
 0x12c   :  { %v168_v27 = vmax.f32 %v163_v23, 0.0 }
 0x12d   :  { %v169_v31 = vpack.c.bf16 %v167_v25, %v167_v25  ;;  %v1098_v25 = vld [vmem:[%s1581_s6] ss:$0 sm:$0xff] }
 0x12e   :  { %v170_v28 = vpack.c.bf16 %v168_v27, %v168_v27 }
 0x130   :  { %609 = vmatprep.mubr.bf16.mxu1 %v170_v28  ;;  %650 = vmatprep.mubr.bf16.mxu0 %v170_v28 }
 0x131   :  { %610 = vmatmul.mubr.bf16.vlgmr.msra.gmra.mrb[0].mxu1 %v169_v31  ;;  %651 = vmatmul.mubr.bf16.vlgmr.msra.gmra.mrb[4].mxu0 %v169_v31 }
 0x132   :  { %1132 = vmatpush3.bf16.msra.mxu1 %v1290_v29  ;;  %1154 = vmatpush3.bf16.msra.mxu0 %v1291_v30 }
 0x133   :  { %1133 = vmatprep.subr.bf16.mxu1 %v1292_v32  ;;  %1155 = vmatprep.subr.bf16.mxu0 %v1293_v33 }
 0x136   :  { %1134 = vmatpush3.bf16.msra.mxu1 %v1294_v34  ;;  %1156 = vmatpush3.bf16.msra.mxu0 %v1295_v35 }
 0x137   :  { %1135 = vmatprep.subr.bf16.mxu1 %v1296_v36  ;;  %1157 = vmatprep.subr.bf16.mxu0 %v1297_v37 }
 0x13a   :  { %1136 = vmatpush3.bf16.msra.mxu1 %v1298_v38  ;;  %1158 = vmatpush3.bf16.msra.mxu0 %v1299_v39 }
 0x13b   :  { %1137 = vmatprep.subr.bf16.mxu1 %v1300_v40  ;;  %1159 = vmatprep.subr.bf16.mxu0 %v1301_v41 }
 0x13e   :  { %1138 = vmatpush3.bf16.msra.mxu1 %v1302_v42  ;;  %1160 = vmatpush3.bf16.msra.mxu0 %v1303_v43 }
 0x13f   :  { %1139 = vmatprep.subr.bf16.mxu1 %v1304_v44  ;;  %1161 = vmatprep.subr.bf16.mxu0 %v1305_v45 }
 0x142   :  { %1140 = vmatpush3.bf16.msra.mxu1 %v1306_v46  ;;  %1162 = vmatpush3.bf16.msra.mxu0 %v1307_v47 }
 0x143   :  { %1141 = vmatprep.subr.bf16.mxu1 %v1308_v48  ;;  %1163 = vmatprep.subr.bf16.mxu0 %v1309_v49 }
 0x146   :  { %1142 = vmatpush3.bf16.msra.mxu1 %v1310_v50  ;;  %1164 = vmatpush3.bf16.msra.mxu0 %v1311_v51 }
 0x147   :  { %1143 = vmatprep.subr.bf16.mxu1 %v1312_v52  ;;  %1165 = vmatprep.subr.bf16.mxu0 %v1313_v53 }
 0x14a   :  { %1144 = vmatpush3.bf16.msra.mxu1 %v1314_v54  ;;  %1166 = vmatpush3.bf16.msra.mxu0 %v1315_v55 }
 0x14b   :  { %1145 = vmatprep.subr.bf16.mxu1 %v1316_v56  ;;  %1167 = vmatprep.subr.bf16.mxu0 %v1317_v57 }
 0x14e   :  { %1146 = vmatpush3.bf16.msra.mxu1 %v1318_v58  ;;  %1168 = vmatpush3.bf16.msra.mxu0 %v1319_v59 }
 0x204   :  { %v611_v3 = vpop.f32.mrb[0].mxu1  ;;  %v652_v4 = vpop.f32.mrb[4].mxu0 }
 0x205   :  { %v612_v5 = vadd.f32 %v611_v3, %v240_v63  ;;  %v653_v6 = vadd.f32 %v652_v4, %v248_v0  ;;  %v613_v7 = vpop.f32.mrb[1].mxu1  ;;  %v654_v8 = vpop.f32.mrb[5].mxu0 }
 0x206   :  { %v614_v9 = vadd.f32 %v613_v7, %v244_v1  ;;  %v655_v10 = vadd.f32 %v654_v8, %v252_v2  ;;  %v615_v11 = vpop.f32.mrb[2].mxu1  ;;  %v656_v12 = vpop.f32.mrb[6].mxu0 }
 0x207   :  { %v659_v13 = vmax.f32 %v612_v5, 0.0  ;;  %v661_v16 = vmax.f32 %v653_v6, 0.0  ;;  %v616_v18 = vpop.f32.mrb[3].mxu1  ;;  %v657_v19 = vpop.f32.mrb[7].mxu0 }
 0x208   :  { %v660_v15 = vmax.f32 %v614_v9, 0.0  ;;  %v662_v20 = vmax.f32 %v655_v10, 0.0 }
 0x209   :  { %v663_v17 = vpack.c.bf16 %v659_v13, %v659_v13  ;;  %v665_v22 = vpack.c.bf16 %v661_v16, %v661_v16 }
 0x20a   :  { %v664_v21 = vpack.c.bf16 %v660_v15, %v660_v15  ;;  %v666_v14 = vpack.c.bf16 %v662_v20, %v662_v20 }
 0x20c   :  { %962 = vmatprep.mubr.bf16.mxu1 %v664_v21  ;;  %1002 = vmatprep.mubr.bf16.mxu0 %v666_v14 }
 0x20d   :  { %963 = vmatmul.mubr.bf16.vlgmr.msra.gmra.mrb[4].mxu1 %v663_v17  ;;  %1003 = vmatmul.mubr.bf16.vlgmr.msra.gmra.mrb[8].mxu0 %v665_v22 }
 0x2e0   :  { %v1147_v23 = vpop.f32.mrb[4].mxu1  ;;  %v1169_v24 = vpop.f32.mrb[8].mxu0 }
 0x2e1   :  { %v1148_v26 = vpop.f32.mrb[5].mxu1  ;;  %v1170_v27 = vpop.f32.mrb[9].mxu0 }
 0x2e2   :  { %v1149_v28 = vadd.f32 %v1148_v26, %v1147_v23  ;;  %v1171_v29 = vadd.f32 %v1170_v27, %v1169_v24  ;;  %v1150_v30 = vpop.f32.mrb[6].mxu1  ;;  %v1172_v31 = vpop.f32.mrb[10].mxu0 }
 0x2e3   :  { %v1151_v32 = vpop.f32.mrb[7].mxu1  ;;  %v1173_v33 = vpop.f32.mrb[11].mxu0 }
 0x2e4   :  { %v965_v34 = vadd.f32 %v1149_v28, %v1098_v25 }
 0x2e6   :  { %v1005_v35 = vadd.f32 %v1171_v29, %v965_v34 }
 0x2e8   :  { %1320 = vtanh.f32 %v1005_v35 }
 0x2f2   :  { %v1321_v36 = vpop.eup %1320 }
 0x2f3   :  { %1011 = vst [vmem:[#allocation10] sm:$0xff] %v1321_v36 }
 0x2f4   :  { %1421 = shalt.err (!%p1418_p8)
}
 0x2f5   :  { %s1422_s12 = scalar_lea.hbm %s1582_s7, 128 }
 0x2f6   :  { %p1423_p9 = scmp.ne.s32.totalorder %s1582_s7, %s1422_s12  ;;  %p1426_p10 = scmp.lt.u32.totalorder %s1422_s12, %s1582_s7 }
 0x2f8   :  { %p1428_p11 = pnand %p1426_p10, %p1423_p9 }
 0x2fa   :  { %1431 = shalt.err (!%p1428_p11)
}
 0x2fb   :  { %1021 = dma.vmem_to_hbm [thread:$0]  %s1019_s9, 128, %s1582_s7, [#allocation4]  }
 0x2fc   :  { %1438 = dma.done.wait [#allocation4], 128  }
 0x2fd   :  { %1439 = vsyncadd [#allocation4], 4294967168 }
 0x2fe   :  { %1025 = vsyncpa [#allocation3], 1 }
 0x2ff   :  { %1026 = vsyncpa [#allocation6], 1 }
 0x300   :  { %1027 = vsyncpa [#allocation9], 1 }
 0x301   :  { %1028 = vsyncpa [#allocation4], 1 }

</bundles_post_ra>
